<compile_context>
chip_gen: v5e
topology: v5e:2x2
jax: 0.10.0
libtpu: 0.0.40
codegen_flags: <defaults>
</compile_context>

<pallas_src>
import functools

import jax
import jax.numpy as jnp
from jax import lax
from jax.experimental import pallas as pl
from jax.experimental.pallas import tpu as pltpu


# ---------------------------------------------------------------------------
# Kernel 1: fused Q/K/V projection pre-pass (Q scale pre-folded into Wq/bq).
# ---------------------------------------------------------------------------
def qkv_proj_kernel(x_ref, w_ref, b_ref, q_ref, k_ref, v_ref, *, d_model):
    x = x_ref[0]                                                   # (tp, D) bf16
    y = jnp.dot(x, w_ref[...],
                preferred_element_type=jnp.float32) + b_ref[...]   # (tp, 3D) f32
    q_ref[0] = y[:, :d_model].astype(q_ref.dtype)
    k_ref[0] = y[:, d_model:2 * d_model].astype(k_ref.dtype)
    v_ref[0] = y[:, 2 * d_model:].astype(v_ref.dtype)


# ---------------------------------------------------------------------------
# Kernel 2: flash attention (online softmax) + fused output projection.
# ---------------------------------------------------------------------------
def mhsa_flash_kernel(q_ref, k_ref, v_ref, wo_ref, bo_ref, o_ref,
                      acc_scr, ml_scr, *, num_heads, head_dim):
    ki = pl.program_id(2)
    nkv = pl.num_programs(2)

    @pl.when(ki == 0)
    def _init():
        acc_scr[...] = jnp.zeros_like(acc_scr)
        # Plane 0 = running max (one lane per head), plane 1 = running denominator.
        ml_scr[0, :, :] = jnp.full(ml_scr.shape[1:], -jnp.inf, ml_scr.dtype)
        ml_scr[1, :, :] = jnp.zeros(ml_scr.shape[1:], ml_scr.dtype)

    q = q_ref[0]   # (tq,  D) bf16 (scale already folded into the projection)
    k = k_ref[0]   # (tkv, D) bf16
    v = v_ref[0]   # (tkv, D) bf16

    for h in range(num_heads):
        sl = slice(h * head_dim, (h + 1) * head_dim)
        # Contract the last dims of both operands: no transposed copy of K.
        s = lax.dot_general(q[:, sl], k[:, sl],
                            dimension_numbers=(((1,), (1,)), ((), ())),
                            preferred_element_type=jnp.float32)    # (tq, tkv) f32

        m_prev = ml_scr[0, :, h:h + 1]                             # (tq, 1)
        l_prev = ml_scr[1, :, h:h + 1]
        m_new = jnp.maximum(m_prev, jnp.max(s, axis=-1, keepdims=True))
        alpha = jnp.exp(m_prev - m_new)
        p = jnp.exp(s - m_new)                                     # unnormalized
        ml_scr[1, :, h:h + 1] = alpha * l_prev + jnp.sum(p, axis=-1, keepdims=True)
        acc_scr[:, sl] = alpha * acc_scr[:, sl] + jnp.dot(
            p.astype(jnp.bfloat16), v[:, sl],
            preferred_element_type=jnp.float32)
        ml_scr[0, :, h:h + 1] = m_new

    @pl.when(ki == nkv - 1)
    def _finalize():
        # Normalize the (tq, hd) context (not the (tq, tkv) probs); 1/l on the EUP.
        for h in range(num_heads):
            sl = slice(h * head_dim, (h + 1) * head_dim)
            acc_scr[:, sl] = acc_scr[:, sl] * pl.reciprocal(
                ml_scr[1, :, h:h + 1], approx=True)
        ctx = acc_scr[...].astype(jnp.bfloat16)                    # (tq, D) bf16
        out = jnp.dot(ctx, wo_ref[...],
                      preferred_element_type=jnp.float32) + bo_ref[...]
        o_ref[0] = out.astype(o_ref.dtype)


def _choose_tile(n, cap):
    """Largest tile <= cap that divides n and is a multiple of 128 (preferred) or 8.

    Falls back to the full extent n, which is always legal for a BlockSpec.
    """
    cap = min(cap, n)
    for align in (128, 8):
        t = (cap // align) * align
        while t >= align:
            if n % t == 0:
                return t
            t -= align
    return n


def mhsa_forward(x, params, num_heads, *, tq=None, tkv=None, tile_cap=256,
                 vmem_limit_bytes=64 * 1024 * 1024):
    """x: [B, S, D]; params: (wq, bq, wk, bk, wv, bv, wo, bo), W stored as [in, out]."""
    B, S, D = x.shape
    assert D % num_heads == 0, "d_model must be divisible by num_heads"
    assert num_heads <= 128, "lane-packed softmax state supports <= 128 heads"
    head_dim = D // num_heads
    wq, bq, wk, bk, wv, bv, wo, bo = params

    if tq is None:
        tq = _choose_tile(S, tile_cap)
    if tkv is None:
        tkv = _choose_tile(S, tile_cap)
    tp = tq
    assert S % tq == 0 and S % tkv == 0 and S % tp == 0

    # Fold attention scale into the Q projection; fuse Q/K/V weights; cast to bf16.
    scale = 1.0 / (float(head_dim) ** 0.5)
    w_qkv = jnp.concatenate([wq * scale, wk, wv], axis=1).astype(jnp.bfloat16)
    b_qkv = jnp.concatenate([bq * scale, bk, bv]).reshape(1, 3 * D).astype(jnp.float32)
    wo_b = wo.astype(jnp.bfloat16)
    bo_r = bo.reshape(1, D).astype(jnp.float32)
    x_b = x.astype(jnp.bfloat16)

    # ---------------- projection pre-pass ----------------
    proj_cost = pl.CostEstimate(
        flops=2 * B * S * D * 3 * D,
        transcendentals=0,
        bytes_accessed=2 * (B * S * D + 3 * D * D + 3 * B * S * D))

    q_all, k_all, v_all = pl.pallas_call(
        functools.partial(qkv_proj_kernel, d_model=D),
        out_shape=tuple(jax.ShapeDtypeStruct((B, S, D), jnp.bfloat16)
                        for _ in range(3)),
        grid=(B, S // tp),
        in_specs=[pl.BlockSpec((1, tp, D), lambda b, si: (b, si, 0)),
                  pl.BlockSpec((D, 3 * D), lambda b, si: (0, 0)),     # fused Wqkv
                  pl.BlockSpec((1, 3 * D), lambda b, si: (0, 0))],    # fused bias
        out_specs=tuple(pl.BlockSpec((1, tp, D), lambda b, si: (b, si, 0))
                        for _ in range(3)),
        compiler_params=pltpu.CompilerParams(
            dimension_semantics=("parallel", "parallel"),
            vmem_limit_bytes=vmem_limit_bytes),
        cost_estimate=proj_cost,
    )(x_b, w_qkv, b_qkv)

    # ---------------- flash attention + output projection ----------------
    flash_cost = pl.CostEstimate(
        flops=4 * B * S * S * D + 2 * B * S * D * D,
        transcendentals=B * num_heads * S * S,
        bytes_accessed=2 * 3 * B * S * D + 2 * D * D + x.dtype.itemsize * B * S * D)

    kernel = functools.partial(mhsa_flash_kernel,
                               num_heads=num_heads, head_dim=head_dim)

    def const2(shape):
        # Constant block index -> weight is DMA'd once and stays resident.
        return pl.BlockSpec(shape, lambda b, qi, ki: (0, 0))

    return pl.pallas_call(
        kernel,
        out_shape=jax.ShapeDtypeStruct((B, S, D), x.dtype),
        grid=(B, S // tq, S // tkv),
        in_specs=[pl.BlockSpec((1, tq, D), lambda b, qi, ki: (b, qi, 0)),   # Q tile
                  pl.BlockSpec((1, tkv, D), lambda b, qi, ki: (b, ki, 0)),  # K tile
                  pl.BlockSpec((1, tkv, D), lambda b, qi, ki: (b, ki, 0)),  # V tile
                  const2((D, D)),                                           # Wo (bf16)
                  const2((1, D))],                                          # bo (f32)
        out_specs=pl.BlockSpec((1, tq, D), lambda b, qi, ki: (b, qi, 0)),
        scratch_shapes=[
            pltpu.VMEM((tq, D), jnp.float32),        # context accumulator
            pltpu.VMEM((2, tq, 128), jnp.float32),   # running max / denom, lane-per-head
        ],
        compiler_params=pltpu.CompilerParams(
            dimension_semantics=("parallel", "parallel", "arbitrary"),
            vmem_limit_bytes=vmem_limit_bytes),
        cost_estimate=flash_cost,
    )(q_all, k_all, v_all, wo_b, bo_r)


def mhsa_reference(x, params, num_heads):
    """Pure-JAX f32 reference mirroring the PyTorch forward exactly."""
    B, S, D = x.shape
    hd = D // num_heads
    wq, bq, wk, bk, wv, bv, wo, bo = params
    q = (x @ wq + bq).reshape(B, S, num_heads, hd).transpose(0, 2, 1, 3)
    k = (x @ wk + bk).reshape(B, S, num_heads, hd).transpose(0, 2, 1, 3)
    v = (x @ wv + bv).reshape(B, S, num_heads, hd).transpose(0, 2, 1, 3)
    scores = jnp.einsum('bhqd,bhkd->bhqk', q, k) / (hd ** 0.5)
    probs = jax.nn.softmax(scores, axis=-1)
    ctx = jnp.einsum('bhqk,bhkd->bhqd', probs, v)
    ctx = ctx.transpose(0, 2, 1, 3).reshape(B, S, D)
    return ctx @ wo + bo


if __name__ == "__main__":
    B, S, D, H = 2, 8, 32, 4  # batch, seq, d_model, num_heads
    key = jax.random.PRNGKey(0)
    ks = jax.random.split(key, 9)

    # Deterministic init (matches torch.nn.Linear's U(-1/sqrt(in), 1/sqrt(in)) scale).
    bound = 1.0 / (D ** 0.5)

    def u(k, shape):
        return jax.random.uniform(k, shape, jnp.float32, -bound, bound)

    x = jax.random.normal(ks[0], (B, S, D), jnp.float32)
    params = (
        u(ks[1], (D, D)), u(ks[2], (D,)),   # query  (W already [in, out])
        u(ks[3], (D, D)), u(ks[4], (D,)),   # key
        u(ks[5], (D, D)), u(ks[6], (D,)),   # value
        u(ks[7], (D, D)), u(ks[8], (D,)),   # out_projection
    )

    # jit so the host-side scale / concat / bf16 casts fold into the compiled graph.
    fwd = jax.jit(functools.partial(mhsa_forward, num_heads=H))
    out = jax.block_until_ready(fwd(x, params))
    ref = mhsa_reference(x, params, H)

    assert out.shape == (B, S, D)
    # Tolerance accounts for bf16 MXU operands + approx reciprocal + flash accumulation.
    assert jnp.allclose(out, ref, atol=3e-2, rtol=3e-2), "mismatch vs reference"

    print("KERNEL_OK")
</pallas_src>

<mosaic_0001>
module attributes {stable_mosaic.version = 11 : i64} {
  func.func @qkv_proj_kernel(%arg0: i32, %arg1: i32, %arg2: memref<1x8x32xbf16, #tpu.memory_space<vmem>>, %arg3: memref<32x96xbf16, #tpu.memory_space<vmem>>, %arg4: memref<1x96xf32, #tpu.memory_space<vmem>>, %arg5: memref<1x8x32xbf16, #tpu.memory_space<vmem>>, %arg6: memref<1x8x32xbf16, #tpu.memory_space<vmem>>, %arg7: memref<1x8x32xbf16, #tpu.memory_space<vmem>>) attributes {dimension_semantics = [#tpu.dimension_semantics<parallel>, #tpu.dimension_semantics<parallel>], iteration_bounds = array<i64: 2, 1>, scalar_prefetch = 0 : i64, scratch_operands = 0 : i64, tpu.core_type = #tpu.core_type<tc>, window_params = [{transform_indices = @transform_0, window_bounds = array<i64: 1, 8, 32>}, {pipeline_mode = #tpu.pipeline_mode<synchronous>, transform_indices = @transform_1, window_bounds = array<i64: 32, 96>}, {pipeline_mode = #tpu.pipeline_mode<synchronous>, transform_indices = @transform_2, window_bounds = array<i64: 1, 96>}, {transform_indices = @transform_3, window_bounds = array<i64: 1, 8, 32>}, {transform_indices = @transform_4, window_bounds = array<i64: 1, 8, 32>}, {transform_indices = @transform_5, window_bounds = array<i64: 1, 8, 32>}]} {
    %c0 = arith.constant 0 : index
    %c0_0 = arith.constant 0 : index
    %c0_1 = arith.constant 0 : index
    %0 = vector.load %arg2[%c0, %c0_0, %c0_1] : memref<1x8x32xbf16, #tpu.memory_space<vmem>>, vector<1x8x32xbf16>
    %1 = vector.shape_cast %0 : vector<1x8x32xbf16> to vector<8x32xbf16>
    %c0_2 = arith.constant 0 : index
    %c0_3 = arith.constant 0 : index
    %2 = vector.load %arg3[%c0_2, %c0_3] : memref<32x96xbf16, #tpu.memory_space<vmem>>, vector<32x96xbf16>
    %cst = arith.constant dense<0.000000e+00> : vector<8x96xf32>
    %3 = tpu.matmul %1, %2, %cst {dimension_numbers = #tpu.dot_dimension_numbers<[1], [0], [0], [1], [0, 0, 1, 1], [], []>} : vector<8x32xbf16>, vector<32x96xbf16>, vector<8x96xf32> -> vector<8x96xf32>
    %c0_4 = arith.constant 0 : index
    %c0_5 = arith.constant 0 : index
    %4 = vector.load %arg4[%c0_4, %c0_5] : memref<1x96xf32, #tpu.memory_space<vmem>>, vector<1x96xf32>
    %5 = vector.broadcast %4 : vector<1x96xf32> to vector<8x96xf32>
    %6 = arith.addf %3, %5 : vector<8x96xf32>
    %7 = vector.extract_strided_slice %6 {offsets = [0, 0], sizes = [8, 32], strides = [1, 1]} : vector<8x96xf32> to vector<8x32xf32>
    %8 = arith.truncf %7 : vector<8x32xf32> to vector<8x32xbf16>
    %c0_6 = arith.constant 0 : index
    %c0_7 = arith.constant 0 : index
    %c0_8 = arith.constant 0 : index
    %9 = vector.load %arg5[%c0_6, %c0_7, %c0_8] : memref<1x8x32xbf16, #tpu.memory_space<vmem>>, vector<1x8x32xbf16>
    %10 = vector.shape_cast %9 : vector<1x8x32xbf16> to vector<8x32xbf16>
    %11 = vector.shape_cast %8 : vector<8x32xbf16> to vector<1x8x32xbf16>
    tpu.vector_store %arg5[%c0_6, %c0_7, %c0_8], %11 {strides = array<i32>} : memref<1x8x32xbf16, #tpu.memory_space<vmem>>, vector<1x8x32xbf16>,
    %12 = vector.extract_strided_slice %6 {offsets = [0, 32], sizes = [8, 32], strides = [1, 1]} : vector<8x96xf32> to vector<8x32xf32>
    %13 = arith.truncf %12 : vector<8x32xf32> to vector<8x32xbf16>
    %c0_9 = arith.constant 0 : index
    %c0_10 = arith.constant 0 : index
    %c0_11 = arith.constant 0 : index
    %14 = vector.load %arg6[%c0_9, %c0_10, %c0_11] : memref<1x8x32xbf16, #tpu.memory_space<vmem>>, vector<1x8x32xbf16>
    %15 = vector.shape_cast %14 : vector<1x8x32xbf16> to vector<8x32xbf16>
    %16 = vector.shape_cast %13 : vector<8x32xbf16> to vector<1x8x32xbf16>
    tpu.vector_store %arg6[%c0_9, %c0_10, %c0_11], %16 {strides = array<i32>} : memref<1x8x32xbf16, #tpu.memory_space<vmem>>, vector<1x8x32xbf16>,
    %17 = vector.extract_strided_slice %6 {offsets = [0, 64], sizes = [8, 32], strides = [1, 1]} : vector<8x96xf32> to vector<8x32xf32>
    %18 = arith.truncf %17 : vector<8x32xf32> to vector<8x32xbf16>
    %c0_12 = arith.constant 0 : index
    %c0_13 = arith.constant 0 : index
    %c0_14 = arith.constant 0 : index
    %19 = vector.load %arg7[%c0_12, %c0_13, %c0_14] : memref<1x8x32xbf16, #tpu.memory_space<vmem>>, vector<1x8x32xbf16>
    %20 = vector.shape_cast %19 : vector<1x8x32xbf16> to vector<8x32xbf16>
    %21 = vector.shape_cast %18 : vector<8x32xbf16> to vector<1x8x32xbf16>
    tpu.vector_store %arg7[%c0_12, %c0_13, %c0_14], %21 {strides = array<i32>} : memref<1x8x32xbf16, #tpu.memory_space<vmem>>, vector<1x8x32xbf16>,
    return
  }
  func.func @transform_0(%arg0: i32, %arg1: i32) -> (i32, i32, i32) {
    %c0_i32 = arith.constant 0 : i32
    %c0_i32_0 = arith.constant 0 : i32
    return %arg0, %arg1, %c0_i32 : i32, i32, i32
  }
  func.func @transform_1(%arg0: i32, %arg1: i32) -> (i32, i32) {
    %c0_i32 = arith.constant 0 : i32
    %c0_i32_0 = arith.constant 0 : i32
    %c0_i32_1 = arith.constant 0 : i32
    return %c0_i32, %c0_i32_0 : i32, i32
  }
  func.func @transform_2(%arg0: i32, %arg1: i32) -> (i32, i32) {
    %c0_i32 = arith.constant 0 : i32
    %c0_i32_0 = arith.constant 0 : i32
    %c0_i32_1 = arith.constant 0 : i32
    return %c0_i32, %c0_i32_0 : i32, i32
  }
  func.func @transform_3(%arg0: i32, %arg1: i32) -> (i32, i32, i32) {
    %c0_i32 = arith.constant 0 : i32
    %c0_i32_0 = arith.constant 0 : i32
    return %arg0, %arg1, %c0_i32 : i32, i32, i32
  }
  func.func @transform_4(%arg0: i32, %arg1: i32) -> (i32, i32, i32) {
    %c0_i32 = arith.constant 0 : i32
    %c0_i32_0 = arith.constant 0 : i32
    return %arg0, %arg1, %c0_i32 : i32, i32, i32
  }
  func.func @transform_5(%arg0: i32, %arg1: i32) -> (i32, i32, i32) {
    %c0_i32 = arith.constant 0 : i32
    %c0_i32_0 = arith.constant 0 : i32
    return %arg0, %arg1, %c0_i32 : i32, i32, i32
  }
}

module attributes {stable_mosaic.version = 11 : i64} {
  func.func @mhsa_flash_kernel(%arg0: i32, %arg1: i32, %arg2: i32, %arg3: memref<1x8x32xbf16, #tpu.memory_space<vmem>>, %arg4: memref<1x8x32xbf16, #tpu.memory_space<vmem>>, %arg5: memref<1x8x32xbf16, #tpu.memory_space<vmem>>, %arg6: memref<32x32xbf16, #tpu.memory_space<vmem>>, %arg7: memref<1x32xf32, #tpu.memory_space<vmem>>, %arg8: memref<1x8x32xf32, #tpu.memory_space<vmem>>, %arg9: memref<8x32xf32, #tpu.memory_space<vmem>>, %arg10: memref<2x8x128xf32, #tpu.memory_space<vmem>>) attributes {dimension_semantics = [#tpu.dimension_semantics<parallel>, #tpu.dimension_semantics<parallel>, #tpu.dimension_semantics<arbitrary>], iteration_bounds = array<i64: 2, 1, 1>, scalar_prefetch = 0 : i64, scratch_operands = 2 : i64, tpu.core_type = #tpu.core_type<tc>, window_params = [{transform_indices = @transform_0, window_bounds = array<i64: 1, 8, 32>}, {transform_indices = @transform_1, window_bounds = array<i64: 1, 8, 32>}, {transform_indices = @transform_2, window_bounds = array<i64: 1, 8, 32>}, {pipeline_mode = #tpu.pipeline_mode<synchronous>, transform_indices = @transform_3, window_bounds = array<i64: 32, 32>}, {pipeline_mode = #tpu.pipeline_mode<synchronous>, transform_indices = @transform_4, window_bounds = array<i64: 1, 32>}, {transform_indices = @transform_5, window_bounds = array<i64: 1, 8, 32>}]} {
    %c0_i32 = arith.constant 0 : i32
    %0 = arith.cmpi eq, %arg2, %c0_i32 : i32
    %1 = arith.extui %0 : i1 to i32
    %c0_i32_0 = arith.constant 0 : i32
    %2 = arith.cmpi ne, %1, %c0_i32_0 : i32
    scf.if %2 {
      %cst_84 = arith.constant 0.000000e+00 : f32
      %144 = vector.broadcast %cst_84 : f32 to vector<8x32xf32>
      %c0_85 = arith.constant 0 : index
      %c0_86 = arith.constant 0 : index
      %145 = vector.load %arg9[%c0_85, %c0_86] : memref<8x32xf32, #tpu.memory_space<vmem>>, vector<8x32xf32>
      tpu.vector_store %arg9[%c0_85, %c0_86], %144 {strides = array<i32>} : memref<8x32xf32, #tpu.memory_space<vmem>>, vector<8x32xf32>,
      %cst_87 = arith.constant 0xFF800000 : f32
      %146 = vector.broadcast %cst_87 : f32 to vector<8x128xf32>
      %c0_88 = arith.constant 0 : index
      %c0_89 = arith.constant 0 : index
      %c0_90 = arith.constant 0 : index
      %147 = vector.load %arg10[%c0_88, %c0_89, %c0_90] : memref<2x8x128xf32, #tpu.memory_space<vmem>>, vector<1x8x128xf32>
      %148 = vector.shape_cast %147 : vector<1x8x128xf32> to vector<8x128xf32>
      %149 = vector.shape_cast %146 : vector<8x128xf32> to vector<1x8x128xf32>
      tpu.vector_store %arg10[%c0_88, %c0_89, %c0_90], %149 {strides = array<i32>} : memref<2x8x128xf32, #tpu.memory_space<vmem>>, vector<1x8x128xf32>,
      %cst_91 = arith.constant 0.000000e+00 : f32
      %150 = vector.broadcast %cst_91 : f32 to vector<8x128xf32>
      %c1_92 = arith.constant 1 : index
      %c0_93 = arith.constant 0 : index
      %c0_94 = arith.constant 0 : index
      %151 = vector.load %arg10[%c1_92, %c0_93, %c0_94] : memref<2x8x128xf32, #tpu.memory_space<vmem>>, vector<1x8x128xf32>
      %152 = vector.shape_cast %151 : vector<1x8x128xf32> to vector<8x128xf32>
      %153 = vector.shape_cast %150 : vector<8x128xf32> to vector<1x8x128xf32>
      tpu.vector_store %arg10[%c1_92, %c0_93, %c0_94], %153 {strides = array<i32>} : memref<2x8x128xf32, #tpu.memory_space<vmem>>, vector<1x8x128xf32>,
    } else {
    }
    %c0 = arith.constant 0 : index
    %c0_1 = arith.constant 0 : index
    %c0_2 = arith.constant 0 : index
    %3 = vector.load %arg3[%c0, %c0_1, %c0_2] : memref<1x8x32xbf16, #tpu.memory_space<vmem>>, vector<1x8x32xbf16>
    %4 = vector.shape_cast %3 : vector<1x8x32xbf16> to vector<8x32xbf16>
    %c0_3 = arith.constant 0 : index
    %c0_4 = arith.constant 0 : index
    %c0_5 = arith.constant 0 : index
    %5 = vector.load %arg4[%c0_3, %c0_4, %c0_5] : memref<1x8x32xbf16, #tpu.memory_space<vmem>>, vector<1x8x32xbf16>
    %6 = vector.shape_cast %5 : vector<1x8x32xbf16> to vector<8x32xbf16>
    %c0_6 = arith.constant 0 : index
    %c0_7 = arith.constant 0 : index
    %c0_8 = arith.constant 0 : index
    %7 = vector.load %arg5[%c0_6, %c0_7, %c0_8] : memref<1x8x32xbf16, #tpu.memory_space<vmem>>, vector<1x8x32xbf16>
    %8 = vector.shape_cast %7 : vector<1x8x32xbf16> to vector<8x32xbf16>
    %9 = vector.extract_strided_slice %4 {offsets = [0, 0], sizes = [8, 8], strides = [1, 1]} : vector<8x32xbf16> to vector<8x8xbf16>
    %10 = vector.extract_strided_slice %6 {offsets = [0, 0], sizes = [8, 8], strides = [1, 1]} : vector<8x32xbf16> to vector<8x8xbf16>
    %cst = arith.constant dense<0.000000e+00> : vector<8x8xf32>
    %11 = tpu.matmul %9, %10, %cst {dimension_numbers = #tpu.dot_dimension_numbers<[1], [1], [0], [0], [0, 0, 1, 0], [], []>} : vector<8x8xbf16>, vector<8x8xbf16>, vector<8x8xf32> -> vector<8x8xf32>
    %c0_9 = arith.constant 0 : index
    %c0_10 = arith.constant 0 : index
    %c0_11 = arith.constant 0 : index
    %12 = vector.load %arg10[%c0_9, %c0_10, %c0_11] : memref<2x8x128xf32, #tpu.memory_space<vmem>>, vector<1x8x1xf32>
    %13 = vector.shape_cast %12 : vector<1x8x1xf32> to vector<8x1xf32>
    %c1 = arith.constant 1 : index
    %c0_12 = arith.constant 0 : index
    %c0_13 = arith.constant 0 : index
    %14 = vector.load %arg10[%c1, %c0_12, %c0_13] : memref<2x8x128xf32, #tpu.memory_space<vmem>>, vector<1x8x1xf32>
    %15 = vector.shape_cast %14 : vector<1x8x1xf32> to vector<8x1xf32>
    %cst_14 = arith.constant dense<0xFF800000> : vector<8xf32>
    %16 = vector.multi_reduction <maximumf>, %11, %cst_14 [1] : vector<8x8xf32> to vector<8xf32>
    %17 = vector.shape_cast %16 : vector<8xf32> to vector<8x1xf32>
    %18 = arith.maximumf %13, %17 : vector<8x1xf32>
    %19 = arith.subf %13, %18 : vector<8x1xf32>
    %20 = math.exp %19 : vector<8x1xf32>
    %21 = vector.broadcast %18 : vector<8x1xf32> to vector<8x8xf32>
    %22 = arith.subf %11, %21 : vector<8x8xf32>
    %23 = math.exp %22 : vector<8x8xf32>
    %24 = arith.mulf %20, %15 : vector<8x1xf32>
    %cst_15 = arith.constant dense<0.000000e+00> : vector<8xf32>
    %25 = vector.multi_reduction <add>, %23, %cst_15 [1] : vector<8x8xf32> to vector<8xf32>
    %26 = vector.shape_cast %25 : vector<8xf32> to vector<8x1xf32>
    %27 = arith.addf %24, %26 : vector<8x1xf32>
    %c1_16 = arith.constant 1 : index
    %c0_17 = arith.constant 0 : index
    %c0_18 = arith.constant 0 : index
    %28 = vector.load %arg10[%c1_16, %c0_17, %c0_18] : memref<2x8x128xf32, #tpu.memory_space<vmem>>, vector<1x8x1xf32>
    %29 = vector.shape_cast %28 : vector<1x8x1xf32> to vector<8x1xf32>
    %30 = vector.shape_cast %27 : vector<8x1xf32> to vector<1x8x1xf32>
    tpu.vector_store %arg10[%c1_16, %c0_17, %c0_18], %30 {strides = array<i32>} : memref<2x8x128xf32, #tpu.memory_space<vmem>>, vector<1x8x1xf32>,
    %c0_19 = arith.constant 0 : index
    %c0_20 = arith.constant 0 : index
    %31 = vector.load %arg9[%c0_19, %c0_20] : memref<8x32xf32, #tpu.memory_space<vmem>>, vector<8x8xf32>
    %32 = vector.broadcast %20 : vector<8x1xf32> to vector<8x8xf32>
    %33 = arith.mulf %32, %31 : vector<8x8xf32>
    %34 = arith.truncf %23 : vector<8x8xf32> to vector<8x8xbf16>
    %35 = vector.extract_strided_slice %8 {offsets = [0, 0], sizes = [8, 8], strides = [1, 1]} : vector<8x32xbf16> to vector<8x8xbf16>
    %cst_21 = arith.constant dense<0.000000e+00> : vector<8x8xf32>
    %36 = tpu.matmul %34, %35, %cst_21 {dimension_numbers = #tpu.dot_dimension_numbers<[1], [0], [0], [1], [0, 0, 1, 1], [], []>} : vector<8x8xbf16>, vector<8x8xbf16>, vector<8x8xf32> -> vector<8x8xf32>
    %37 = arith.addf %33, %36 : vector<8x8xf32>
    %c0_22 = arith.constant 0 : index
    %c0_23 = arith.constant 0 : index
    %38 = vector.load %arg9[%c0_22, %c0_23] : memref<8x32xf32, #tpu.memory_space<vmem>>, vector<8x8xf32>
    tpu.vector_store %arg9[%c0_22, %c0_23], %37 {strides = array<i32>} : memref<8x32xf32, #tpu.memory_space<vmem>>, vector<8x8xf32>,
    %c0_24 = arith.constant 0 : index
    %c0_25 = arith.constant 0 : index
    %c0_26 = arith.constant 0 : index
    %39 = vector.load %arg10[%c0_24, %c0_25, %c0_26] : memref<2x8x128xf32, #tpu.memory_space<vmem>>, vector<1x8x1xf32>
    %40 = vector.shape_cast %39 : vector<1x8x1xf32> to vector<8x1xf32>
    %41 = vector.shape_cast %18 : vector<8x1xf32> to vector<1x8x1xf32>
    tpu.vector_store %arg10[%c0_24, %c0_25, %c0_26], %41 {strides = array<i32>} : memref<2x8x128xf32, #tpu.memory_space<vmem>>, vector<1x8x1xf32>,
    %42 = vector.extract_strided_slice %4 {offsets = [0, 8], sizes = [8, 8], strides = [1, 1]} : vector<8x32xbf16> to vector<8x8xbf16>
    %43 = vector.extract_strided_slice %6 {offsets = [0, 8], sizes = [8, 8], strides = [1, 1]} : vector<8x32xbf16> to vector<8x8xbf16>
    %cst_27 = arith.constant dense<0.000000e+00> : vector<8x8xf32>
    %44 = tpu.matmul %42, %43, %cst_27 {dimension_numbers = #tpu.dot_dimension_numbers<[1], [1], [0], [0], [0, 0, 1, 0], [], []>} : vector<8x8xbf16>, vector<8x8xbf16>, vector<8x8xf32> -> vector<8x8xf32>
    %c0_28 = arith.constant 0 : index
    %c0_29 = arith.constant 0 : index
    %c1_30 = arith.constant 1 : index
    %45 = vector.load %arg10[%c0_28, %c0_29, %c1_30] : memref<2x8x128xf32, #tpu.memory_space<vmem>>, vector<1x8x1xf32>
    %46 = vector.shape_cast %45 : vector<1x8x1xf32> to vector<8x1xf32>
    %c1_31 = arith.constant 1 : index
    %c0_32 = arith.constant 0 : index
    %c1_33 = arith.constant 1 : index
    %47 = vector.load %arg10[%c1_31, %c0_32, %c1_33] : memref<2x8x128xf32, #tpu.memory_space<vmem>>, vector<1x8x1xf32>
    %48 = vector.shape_cast %47 : vector<1x8x1xf32> to vector<8x1xf32>
    %cst_34 = arith.constant dense<0xFF800000> : vector<8xf32>
    %49 = vector.multi_reduction <maximumf>, %44, %cst_34 [1] : vector<8x8xf32> to vector<8xf32>
    %50 = vector.shape_cast %49 : vector<8xf32> to vector<8x1xf32>
    %51 = arith.maximumf %46, %50 : vector<8x1xf32>
    %52 = arith.subf %46, %51 : vector<8x1xf32>
    %53 = math.exp %52 : vector<8x1xf32>
    %54 = vector.broadcast %51 : vector<8x1xf32> to vector<8x8xf32>
    %55 = arith.subf %44, %54 : vector<8x8xf32>
    %56 = math.exp %55 : vector<8x8xf32>
    %57 = arith.mulf %53, %48 : vector<8x1xf32>
    %cst_35 = arith.constant dense<0.000000e+00> : vector<8xf32>
    %58 = vector.multi_reduction <add>, %56, %cst_35 [1] : vector<8x8xf32> to vector<8xf32>
    %59 = vector.shape_cast %58 : vector<8xf32> to vector<8x1xf32>
    %60 = arith.addf %57, %59 : vector<8x1xf32>
    %c1_36 = arith.constant 1 : index
    %c0_37 = arith.constant 0 : index
    %c1_38 = arith.constant 1 : index
    %61 = vector.load %arg10[%c1_36, %c0_37, %c1_38] : memref<2x8x128xf32, #tpu.memory_space<vmem>>, vector<1x8x1xf32>
    %62 = vector.shape_cast %61 : vector<1x8x1xf32> to vector<8x1xf32>
    %63 = vector.shape_cast %60 : vector<8x1xf32> to vector<1x8x1xf32>
    tpu.vector_store %arg10[%c1_36, %c0_37, %c1_38], %63 {strides = array<i32>} : memref<2x8x128xf32, #tpu.memory_space<vmem>>, vector<1x8x1xf32>,
    %c0_39 = arith.constant 0 : index
    %c8 = arith.constant 8 : index
    %64 = vector.load %arg9[%c0_39, %c8] : memref<8x32xf32, #tpu.memory_space<vmem>>, vector<8x8xf32>
    %65 = vector.broadcast %53 : vector<8x1xf32> to vector<8x8xf32>
    %66 = arith.mulf %65, %64 : vector<8x8xf32>
    %67 = arith.truncf %56 : vector<8x8xf32> to vector<8x8xbf16>
    %68 = vector.extract_strided_slice %8 {offsets = [0, 8], sizes = [8, 8], strides = [1, 1]} : vector<8x32xbf16> to vector<8x8xbf16>
    %cst_40 = arith.constant dense<0.000000e+00> : vector<8x8xf32>
    %69 = tpu.matmul %67, %68, %cst_40 {dimension_numbers = #tpu.dot_dimension_numbers<[1], [0], [0], [1], [0, 0, 1, 1], [], []>} : vector<8x8xbf16>, vector<8x8xbf16>, vector<8x8xf32> -> vector<8x8xf32>
    %70 = arith.addf %66, %69 : vector<8x8xf32>
    %c0_41 = arith.constant 0 : index
    %c8_42 = arith.constant 8 : index
    %71 = vector.load %arg9[%c0_41, %c8_42] : memref<8x32xf32, #tpu.memory_space<vmem>>, vector<8x8xf32>
    tpu.vector_store %arg9[%c0_41, %c8_42], %70 {strides = array<i32>} : memref<8x32xf32, #tpu.memory_space<vmem>>, vector<8x8xf32>,
    %c0_43 = arith.constant 0 : index
    %c0_44 = arith.constant 0 : index
    %c1_45 = arith.constant 1 : index
    %72 = vector.load %arg10[%c0_43, %c0_44, %c1_45] : memref<2x8x128xf32, #tpu.memory_space<vmem>>, vector<1x8x1xf32>
    %73 = vector.shape_cast %72 : vector<1x8x1xf32> to vector<8x1xf32>
    %74 = vector.shape_cast %51 : vector<8x1xf32> to vector<1x8x1xf32>
    tpu.vector_store %arg10[%c0_43, %c0_44, %c1_45], %74 {strides = array<i32>} : memref<2x8x128xf32, #tpu.memory_space<vmem>>, vector<1x8x1xf32>,
    %75 = vector.extract_strided_slice %4 {offsets = [0, 16], sizes = [8, 8], strides = [1, 1]} : vector<8x32xbf16> to vector<8x8xbf16>
    %76 = vector.extract_strided_slice %6 {offsets = [0, 16], sizes = [8, 8], strides = [1, 1]} : vector<8x32xbf16> to vector<8x8xbf16>
    %cst_46 = arith.constant dense<0.000000e+00> : vector<8x8xf32>
    %77 = tpu.matmul %75, %76, %cst_46 {dimension_numbers = #tpu.dot_dimension_numbers<[1], [1], [0], [0], [0, 0, 1, 0], [], []>} : vector<8x8xbf16>, vector<8x8xbf16>, vector<8x8xf32> -> vector<8x8xf32>
    %c0_47 = arith.constant 0 : index
    %c0_48 = arith.constant 0 : index
    %c2 = arith.constant 2 : index
    %78 = vector.load %arg10[%c0_47, %c0_48, %c2] : memref<2x8x128xf32, #tpu.memory_space<vmem>>, vector<1x8x1xf32>
    %79 = vector.shape_cast %78 : vector<1x8x1xf32> to vector<8x1xf32>
    %c1_49 = arith.constant 1 : index
    %c0_50 = arith.constant 0 : index
    %c2_51 = arith.constant 2 : index
    %80 = vector.load %arg10[%c1_49, %c0_50, %c2_51] : memref<2x8x128xf32, #tpu.memory_space<vmem>>, vector<1x8x1xf32>
    %81 = vector.shape_cast %80 : vector<1x8x1xf32> to vector<8x1xf32>
    %cst_52 = arith.constant dense<0xFF800000> : vector<8xf32>
    %82 = vector.multi_reduction <maximumf>, %77, %cst_52 [1] : vector<8x8xf32> to vector<8xf32>
    %83 = vector.shape_cast %82 : vector<8xf32> to vector<8x1xf32>
    %84 = arith.maximumf %79, %83 : vector<8x1xf32>
    %85 = arith.subf %79, %84 : vector<8x1xf32>
    %86 = math.exp %85 : vector<8x1xf32>
    %87 = vector.broadcast %84 : vector<8x1xf32> to vector<8x8xf32>
    %88 = arith.subf %77, %87 : vector<8x8xf32>
    %89 = math.exp %88 : vector<8x8xf32>
    %90 = arith.mulf %86, %81 : vector<8x1xf32>
    %cst_53 = arith.constant dense<0.000000e+00> : vector<8xf32>
    %91 = vector.multi_reduction <add>, %89, %cst_53 [1] : vector<8x8xf32> to vector<8xf32>
    %92 = vector.shape_cast %91 : vector<8xf32> to vector<8x1xf32>
    %93 = arith.addf %90, %92 : vector<8x1xf32>
    %c1_54 = arith.constant 1 : index
    %c0_55 = arith.constant 0 : index
    %c2_56 = arith.constant 2 : index
    %94 = vector.load %arg10[%c1_54, %c0_55, %c2_56] : memref<2x8x128xf32, #tpu.memory_space<vmem>>, vector<1x8x1xf32>
    %95 = vector.shape_cast %94 : vector<1x8x1xf32> to vector<8x1xf32>
    %96 = vector.shape_cast %93 : vector<8x1xf32> to vector<1x8x1xf32>
    tpu.vector_store %arg10[%c1_54, %c0_55, %c2_56], %96 {strides = array<i32>} : memref<2x8x128xf32, #tpu.memory_space<vmem>>, vector<1x8x1xf32>,
    %c0_57 = arith.constant 0 : index
    %c16 = arith.constant 16 : index
    %97 = vector.load %arg9[%c0_57, %c16] : memref<8x32xf32, #tpu.memory_space<vmem>>, vector<8x8xf32>
    %98 = vector.broadcast %86 : vector<8x1xf32> to vector<8x8xf32>
    %99 = arith.mulf %98, %97 : vector<8x8xf32>
    %100 = arith.truncf %89 : vector<8x8xf32> to vector<8x8xbf16>
    %101 = vector.extract_strided_slice %8 {offsets = [0, 16], sizes = [8, 8], strides = [1, 1]} : vector<8x32xbf16> to vector<8x8xbf16>
    %cst_58 = arith.constant dense<0.000000e+00> : vector<8x8xf32>
    %102 = tpu.matmul %100, %101, %cst_58 {dimension_numbers = #tpu.dot_dimension_numbers<[1], [0], [0], [1], [0, 0, 1, 1], [], []>} : vector<8x8xbf16>, vector<8x8xbf16>, vector<8x8xf32> -> vector<8x8xf32>
    %103 = arith.addf %99, %102 : vector<8x8xf32>
    %c0_59 = arith.constant 0 : index
    %c16_60 = arith.constant 16 : index
    %104 = vector.load %arg9[%c0_59, %c16_60] : memref<8x32xf32, #tpu.memory_space<vmem>>, vector<8x8xf32>
    tpu.vector_store %arg9[%c0_59, %c16_60], %103 {strides = array<i32>} : memref<8x32xf32, #tpu.memory_space<vmem>>, vector<8x8xf32>,
    %c0_61 = arith.constant 0 : index
    %c0_62 = arith.constant 0 : index
    %c2_63 = arith.constant 2 : index
    %105 = vector.load %arg10[%c0_61, %c0_62, %c2_63] : memref<2x8x128xf32, #tpu.memory_space<vmem>>, vector<1x8x1xf32>
    %106 = vector.shape_cast %105 : vector<1x8x1xf32> to vector<8x1xf32>
    %107 = vector.shape_cast %84 : vector<8x1xf32> to vector<1x8x1xf32>
    tpu.vector_store %arg10[%c0_61, %c0_62, %c2_63], %107 {strides = array<i32>} : memref<2x8x128xf32, #tpu.memory_space<vmem>>, vector<1x8x1xf32>,
    %108 = vector.extract_strided_slice %4 {offsets = [0, 24], sizes = [8, 8], strides = [1, 1]} : vector<8x32xbf16> to vector<8x8xbf16>
    %109 = vector.extract_strided_slice %6 {offsets = [0, 24], sizes = [8, 8], strides = [1, 1]} : vector<8x32xbf16> to vector<8x8xbf16>
    %cst_64 = arith.constant dense<0.000000e+00> : vector<8x8xf32>
    %110 = tpu.matmul %108, %109, %cst_64 {dimension_numbers = #tpu.dot_dimension_numbers<[1], [1], [0], [0], [0, 0, 1, 0], [], []>} : vector<8x8xbf16>, vector<8x8xbf16>, vector<8x8xf32> -> vector<8x8xf32>
    %c0_65 = arith.constant 0 : index
    %c0_66 = arith.constant 0 : index
    %c3 = arith.constant 3 : index
    %111 = vector.load %arg10[%c0_65, %c0_66, %c3] : memref<2x8x128xf32, #tpu.memory_space<vmem>>, vector<1x8x1xf32>
    %112 = vector.shape_cast %111 : vector<1x8x1xf32> to vector<8x1xf32>
    %c1_67 = arith.constant 1 : index
    %c0_68 = arith.constant 0 : index
    %c3_69 = arith.constant 3 : index
    %113 = vector.load %arg10[%c1_67, %c0_68, %c3_69] : memref<2x8x128xf32, #tpu.memory_space<vmem>>, vector<1x8x1xf32>
    %114 = vector.shape_cast %113 : vector<1x8x1xf32> to vector<8x1xf32>
    %cst_70 = arith.constant dense<0xFF800000> : vector<8xf32>
    %115 = vector.multi_reduction <maximumf>, %110, %cst_70 [1] : vector<8x8xf32> to vector<8xf32>
    %116 = vector.shape_cast %115 : vector<8xf32> to vector<8x1xf32>
    %117 = arith.maximumf %112, %116 : vector<8x1xf32>
    %118 = arith.subf %112, %117 : vector<8x1xf32>
    %119 = math.exp %118 : vector<8x1xf32>
    %120 = vector.broadcast %117 : vector<8x1xf32> to vector<8x8xf32>
    %121 = arith.subf %110, %120 : vector<8x8xf32>
    %122 = math.exp %121 : vector<8x8xf32>
    %123 = arith.mulf %119, %114 : vector<8x1xf32>
    %cst_71 = arith.constant dense<0.000000e+00> : vector<8xf32>
    %124 = vector.multi_reduction <add>, %122, %cst_71 [1] : vector<8x8xf32> to vector<8xf32>
    %125 = vector.shape_cast %124 : vector<8xf32> to vector<8x1xf32>
    %126 = arith.addf %123, %125 : vector<8x1xf32>
    %c1_72 = arith.constant 1 : index
    %c0_73 = arith.constant 0 : index
    %c3_74 = arith.constant 3 : index
    %127 = vector.load %arg10[%c1_72, %c0_73, %c3_74] : memref<2x8x128xf32, #tpu.memory_space<vmem>>, vector<1x8x1xf32>
    %128 = vector.shape_cast %127 : vector<1x8x1xf32> to vector<8x1xf32>
    %129 = vector.shape_cast %126 : vector<8x1xf32> to vector<1x8x1xf32>
    tpu.vector_store %arg10[%c1_72, %c0_73, %c3_74], %129 {strides = array<i32>} : memref<2x8x128xf32, #tpu.memory_space<vmem>>, vector<1x8x1xf32>,
    %c0_75 = arith.constant 0 : index
    %c24 = arith.constant 24 : index
    %130 = vector.load %arg9[%c0_75, %c24] : memref<8x32xf32, #tpu.memory_space<vmem>>, vector<8x8xf32>
    %131 = vector.broadcast %119 : vector<8x1xf32> to vector<8x8xf32>
    %132 = arith.mulf %131, %130 : vector<8x8xf32>
    %133 = arith.truncf %122 : vector<8x8xf32> to vector<8x8xbf16>
    %134 = vector.extract_strided_slice %8 {offsets = [0, 24], sizes = [8, 8], strides = [1, 1]} : vector<8x32xbf16> to vector<8x8xbf16>
    %cst_76 = arith.constant dense<0.000000e+00> : vector<8x8xf32>
    %135 = tpu.matmul %133, %134, %cst_76 {dimension_numbers = #tpu.dot_dimension_numbers<[1], [0], [0], [1], [0, 0, 1, 1], [], []>} : vector<8x8xbf16>, vector<8x8xbf16>, vector<8x8xf32> -> vector<8x8xf32>
    %136 = arith.addf %132, %135 : vector<8x8xf32>
    %c0_77 = arith.constant 0 : index
    %c24_78 = arith.constant 24 : index
    %137 = vector.load %arg9[%c0_77, %c24_78] : memref<8x32xf32, #tpu.memory_space<vmem>>, vector<8x8xf32>
    tpu.vector_store %arg9[%c0_77, %c24_78], %136 {strides = array<i32>} : memref<8x32xf32, #tpu.memory_space<vmem>>, vector<8x8xf32>,
    %c0_79 = arith.constant 0 : index
    %c0_80 = arith.constant 0 : index
    %c3_81 = arith.constant 3 : index
    %138 = vector.load %arg10[%c0_79, %c0_80, %c3_81] : memref<2x8x128xf32, #tpu.memory_space<vmem>>, vector<1x8x1xf32>
    %139 = vector.shape_cast %138 : vector<1x8x1xf32> to vector<8x1xf32>
    %140 = vector.shape_cast %117 : vector<8x1xf32> to vector<1x8x1xf32>
    tpu.vector_store %arg10[%c0_79, %c0_80, %c3_81], %140 {strides = array<i32>} : memref<2x8x128xf32, #tpu.memory_space<vmem>>, vector<1x8x1xf32>,
    %c0_i32_82 = arith.constant 0 : i32
    %141 = arith.cmpi eq, %arg2, %c0_i32_82 : i32
    %142 = arith.extui %141 : i1 to i32
    %c0_i32_83 = arith.constant 0 : i32
    %143 = arith.cmpi ne, %142, %c0_i32_83 : i32
    scf.if %143 {
      %c0_84 = arith.constant 0 : index
      %c0_85 = arith.constant 0 : index
      %144 = vector.load %arg9[%c0_84, %c0_85] : memref<8x32xf32, #tpu.memory_space<vmem>>, vector<8x8xf32>
      %c1_86 = arith.constant 1 : index
      %c0_87 = arith.constant 0 : index
      %c0_88 = arith.constant 0 : index
      %145 = vector.load %arg10[%c1_86, %c0_87, %c0_88] : memref<2x8x128xf32, #tpu.memory_space<vmem>>, vector<1x8x1xf32>
      %146 = vector.shape_cast %145 : vector<1x8x1xf32> to vector<8x1xf32>
      %147 = tpu.reciprocal %146 {approx = true} : vector<8x1xf32> -> vector<8x1xf32>
      %148 = vector.broadcast %147 : vector<8x1xf32> to vector<8x8xf32>
      %149 = arith.mulf %144, %148 : vector<8x8xf32>
      %c0_89 = arith.constant 0 : index
      %c0_90 = arith.constant 0 : index
      %150 = vector.load %arg9[%c0_89, %c0_90] : memref<8x32xf32, #tpu.memory_space<vmem>>, vector<8x8xf32>
      tpu.vector_store %arg9[%c0_89, %c0_90], %149 {strides = array<i32>} : memref<8x32xf32, #tpu.memory_space<vmem>>, vector<8x8xf32>,
      %c0_91 = arith.constant 0 : index
      %c8_92 = arith.constant 8 : index
      %151 = vector.load %arg9[%c0_91, %c8_92] : memref<8x32xf32, #tpu.memory_space<vmem>>, vector<8x8xf32>
      %c1_93 = arith.constant 1 : index
      %c0_94 = arith.constant 0 : index
      %c1_95 = arith.constant 1 : index
      %152 = vector.load %arg10[%c1_93, %c0_94, %c1_95] : memref<2x8x128xf32, #tpu.memory_space<vmem>>, vector<1x8x1xf32>
      %153 = vector.shape_cast %152 : vector<1x8x1xf32> to vector<8x1xf32>
      %154 = tpu.reciprocal %153 {approx = true} : vector<8x1xf32> -> vector<8x1xf32>
      %155 = vector.broadcast %154 : vector<8x1xf32> to vector<8x8xf32>
      %156 = arith.mulf %151, %155 : vector<8x8xf32>
      %c0_96 = arith.constant 0 : index
      %c8_97 = arith.constant 8 : index
      %157 = vector.load %arg9[%c0_96, %c8_97] : memref<8x32xf32, #tpu.memory_space<vmem>>, vector<8x8xf32>
      tpu.vector_store %arg9[%c0_96, %c8_97], %156 {strides = array<i32>} : memref<8x32xf32, #tpu.memory_space<vmem>>, vector<8x8xf32>,
      %c0_98 = arith.constant 0 : index
      %c16_99 = arith.constant 16 : index
      %158 = vector.load %arg9[%c0_98, %c16_99] : memref<8x32xf32, #tpu.memory_space<vmem>>, vector<8x8xf32>
      %c1_100 = arith.constant 1 : index
      %c0_101 = arith.constant 0 : index
      %c2_102 = arith.constant 2 : index
      %159 = vector.load %arg10[%c1_100, %c0_101, %c2_102] : memref<2x8x128xf32, #tpu.memory_space<vmem>>, vector<1x8x1xf32>
      %160 = vector.shape_cast %159 : vector<1x8x1xf32> to vector<8x1xf32>
      %161 = tpu.reciprocal %160 {approx = true} : vector<8x1xf32> -> vector<8x1xf32>
      %162 = vector.broadcast %161 : vector<8x1xf32> to vector<8x8xf32>
      %163 = arith.mulf %158, %162 : vector<8x8xf32>
      %c0_103 = arith.constant 0 : index
      %c16_104 = arith.constant 16 : index
      %164 = vector.load %arg9[%c0_103, %c16_104] : memref<8x32xf32, #tpu.memory_space<vmem>>, vector<8x8xf32>
      tpu.vector_store %arg9[%c0_103, %c16_104], %163 {strides = array<i32>} : memref<8x32xf32, #tpu.memory_space<vmem>>, vector<8x8xf32>,
      %c0_105 = arith.constant 0 : index
      %c24_106 = arith.constant 24 : index
      %165 = vector.load %arg9[%c0_105, %c24_106] : memref<8x32xf32, #tpu.memory_space<vmem>>, vector<8x8xf32>
      %c1_107 = arith.constant 1 : index
      %c0_108 = arith.constant 0 : index
      %c3_109 = arith.constant 3 : index
      %166 = vector.load %arg10[%c1_107, %c0_108, %c3_109] : memref<2x8x128xf32, #tpu.memory_space<vmem>>, vector<1x8x1xf32>
      %167 = vector.shape_cast %166 : vector<1x8x1xf32> to vector<8x1xf32>
      %168 = tpu.reciprocal %167 {approx = true} : vector<8x1xf32> -> vector<8x1xf32>
      %169 = vector.broadcast %168 : vector<8x1xf32> to vector<8x8xf32>
      %170 = arith.mulf %165, %169 : vector<8x8xf32>
      %c0_110 = arith.constant 0 : index
      %c24_111 = arith.constant 24 : index
      %171 = vector.load %arg9[%c0_110, %c24_111] : memref<8x32xf32, #tpu.memory_space<vmem>>, vector<8x8xf32>
      tpu.vector_store %arg9[%c0_110, %c24_111], %170 {strides = array<i32>} : memref<8x32xf32, #tpu.memory_space<vmem>>, vector<8x8xf32>,
      %c0_112 = arith.constant 0 : index
      %c0_113 = arith.constant 0 : index
      %172 = vector.load %arg9[%c0_112, %c0_113] : memref<8x32xf32, #tpu.memory_space<vmem>>, vector<8x32xf32>
      %173 = arith.truncf %172 : vector<8x32xf32> to vector<8x32xbf16>
      %c0_114 = arith.constant 0 : index
      %c0_115 = arith.constant 0 : index
      %174 = vector.load %arg6[%c0_114, %c0_115] : memref<32x32xbf16, #tpu.memory_space<vmem>>, vector<32x32xbf16>
      %cst_116 = arith.constant dense<0.000000e+00> : vector<8x32xf32>
      %175 = tpu.matmul %173, %174, %cst_116 {dimension_numbers = #tpu.dot_dimension_numbers<[1], [0], [0], [1], [0, 0, 1, 1], [], []>} : vector<8x32xbf16>, vector<32x32xbf16>, vector<8x32xf32> -> vector<8x32xf32>
      %c0_117 = arith.constant 0 : index
      %c0_118 = arith.constant 0 : index
      %176 = vector.load %arg7[%c0_117, %c0_118] : memref<1x32xf32, #tpu.memory_space<vmem>>, vector<1x32xf32>
      %177 = vector.broadcast %176 : vector<1x32xf32> to vector<8x32xf32>
      %178 = arith.addf %175, %177 : vector<8x32xf32>
      %c0_119 = arith.constant 0 : index
      %c0_120 = arith.constant 0 : index
      %c0_121 = arith.constant 0 : index
      %179 = vector.load %arg8[%c0_119, %c0_120, %c0_121] : memref<1x8x32xf32, #tpu.memory_space<vmem>>, vector<1x8x32xf32>
      %180 = vector.shape_cast %179 : vector<1x8x32xf32> to vector<8x32xf32>
      %181 = vector.shape_cast %178 : vector<8x32xf32> to vector<1x8x32xf32>
      tpu.vector_store %arg8[%c0_119, %c0_120, %c0_121], %181 {strides = array<i32>} : memref<1x8x32xf32, #tpu.memory_space<vmem>>, vector<1x8x32xf32>,
    } else {
    }
    return
  }
  func.func @transform_0(%arg0: i32, %arg1: i32, %arg2: i32) -> (i32, i32, i32) {
    %c0_i32 = arith.constant 0 : i32
    %c0_i32_0 = arith.constant 0 : i32
    return %arg0, %arg1, %c0_i32 : i32, i32, i32
  }
  func.func @transform_1(%arg0: i32, %arg1: i32, %arg2: i32) -> (i32, i32, i32) {
    %c0_i32 = arith.constant 0 : i32
    %c0_i32_0 = arith.constant 0 : i32
    return %arg0, %arg2, %c0_i32 : i32, i32, i32
  }
  func.func @transform_2(%arg0: i32, %arg1: i32, %arg2: i32) -> (i32, i32, i32) {
    %c0_i32 = arith.constant 0 : i32
    %c0_i32_0 = arith.constant 0 : i32
    return %arg0, %arg2, %c0_i32 : i32, i32, i32
  }
  func.func @transform_3(%arg0: i32, %arg1: i32, %arg2: i32) -> (i32, i32) {
    %c0_i32 = arith.constant 0 : i32
    %c0_i32_0 = arith.constant 0 : i32
    %c0_i32_1 = arith.constant 0 : i32
    return %c0_i32, %c0_i32_0 : i32, i32
  }
  func.func @transform_4(%arg0: i32, %arg1: i32, %arg2: i32) -> (i32, i32) {
    %c0_i32 = arith.constant 0 : i32
    %c0_i32_0 = arith.constant 0 : i32
    %c0_i32_1 = arith.constant 0 : i32
    return %c0_i32, %c0_i32_0 : i32, i32
  }
  func.func @transform_5(%arg0: i32, %arg1: i32, %arg2: i32) -> (i32, i32, i32) {
    %c0_i32 = arith.constant 0 : i32
    %c0_i32_0 = arith.constant 0 : i32
    return %arg0, %arg1, %c0_i32 : i32, i32, i32
  }
}

</mosaic_0001>

<bundles_post_ra>
// kernel: mhsa_forward.2
= control target key start
LH: loop header
LB: loop body
LE: loop exit
PB: predicated region body
PF: predicated region fallthrough
CT: control target
= control target key end

     0   :  { %s600_s18 = smov 0   ;;  %s602_s19 = smov 0   ;;  %s648_s0 = inlined_call_operand.vmem [shape: bf16[2,8,32], index: 0, kind: input, shape index: {}]   ;;  %s649_s1 = inlined_call_operand.vmem [shape: bf16[32,96], index: 1, kind: input, shape index: {}]   ;;  %s650_s2 = inlined_call_operand.vmem [shape: f32[1,96], index: 2, kind: input, shape index: {}]   ;;  %s651_s3 = inlined_call_operand.vmem [shape: bf16[2,8,32], index: 3, kind: output, shape index: {0}]   ;;  %s652_s4 = inlined_call_operand.vmem [shape: bf16[2,8,32], index: 4, kind: output, shape index: {1}]   ;;  %s653_s5 = inlined_call_operand.vmem [shape: bf16[2,8,32], index: 5, kind: output, shape index: {2}]  }
   0x1   :  { %s604_s20 = smov 0  }
   0x2 LB: > { %s28_s21 = sadd.s32 1, %s562_s19  ;;  %p499_p0 = scmp.ge.s32.totalorder %s566_s20, 1  ;;  %s566_s20 = sphi %s604_s20, %s16_s20   ;;  %s562_s19 = sphi %s602_s19, %s655_s19   ;;  %s558_s18 = sphi %s600_s18, %s654_s18  }
   0x3   : > { %p30_p1 = scmp.ge.s32.totalorder %s28_s21, 2  ;;  %p214_p2 = scmp.lt.s32.totalorder %s566_s20, 3 }
   0x5   : > { %s657_s21 = smov (%p30_p1, %s28_s21), 0  ;;  %p215_p3 = pnand %p499_p0, %p214_p2 }
   0x6   : > { %p260_p4 = scmp.lt.s32.totalorder (!%p215_p3), %s558_s18, 1  ;;  %s568_s10 = smov (!%p215_p3), 96  }
   0x7   : > { %218 = sbr.rel (%p215_p3) target bundleno = 274 (0x112), region = 32  ;;  %s569_s11 = smov (!%p215_p3), 64  }
   0xc   : > { %v516_v0 = vld [vmem:[%s649_s1 + $0x8] sm:$0xff]  ;;  %v515_v1 = vld [vmem:[%s649_s1] sm:$0xff]  ;;  %s659_s18 = smov (!%p260_p4, %s558_s18), 1  ;;  %vm310_vm0 = vcmask 261120   ;;  %vm328_vm1 = vcmask 257024  }
   0xd   : > { %320 = vmatpush.bf16.msra.mxu0 %v516_v0  ;;  %s500_s26 = sshll.u32 %s659_s18, 2  ;;  %v543_v3 = vld [vmem:[%s650_s2] ss:$0 sm:$0xff] }
   0xe   : > { %s266_s29 = scalar_lea.vmem %s648_s0, %s500_s26  ;;  %s273_s9 = scalar_lea.vmem %s651_s3, %s500_s26 }
   0xf   : > { %v289_v2 = vld [vmem:[%s266_s29] sm:$0xf]  ;;  %s280_s14 = scalar_lea.vmem %s652_s4, %s500_s26  ;;  %s287_s17 = scalar_lea.vmem %s653_s5, %s500_s26 }
  0x11   : > { %321 = vmatpush.bf16.msra.mxu0 %v515_v1 }
  0x14   : > { %512 = vmatmul.msk.bf16.vlgmr.msra.gmra.mxu0 %vm310_vm0, %v289_v2 }
  0x91   : > { %v323_v4 = vpop.f32.mrf.mxu0 }
  0x92   : > { %v324_v5 = vadd.f32 %v543_v3, %v323_v4 }
  0x94   : > { %v327_v6 = vpack.c.bf16 %v324_v5, %v324_v5 }
  0x96   : > { %331 = vrot.lane.b32.xlu0 %v327_v6, %s568_s10  ;;  %329 = vst.msk [vmem:[%s273_s9] sm:$0xf] %vm328_vm1, %v327_v6 }
  0x99   : > { %v325_v7 = vpop.f32.mrf.mxu0 }
  0x9e   : > { %335 = vrot.lane.b32.xlu0 %v327_v6, %s569_s11 }
 0x108   : > { %v332_v8 = vpop.permute.xlu0 %331 }
 0x109   : > { %334 = vst.msk [vmem:[%s280_s14] sm:$0xf] %vm328_vm1, %v332_v8 }
 0x110   : > { %v336_v9 = vpop.permute.xlu0 %335 }
 0x111   : > { %338 = vst.msk [vmem:[%s287_s17] sm:$0xf] %vm328_vm1, %v336_v9 }
 0x112 PF: > { %s16_s20 = sadd.s32 1, %s566_s20   ;;  %s654_s18 = smov %s562_s19 }
 0x113   : > { %p13_p5 = scmp.ge.s32.totalorder %s16_s20, 4   ;;  %s655_s19 = smov %s657_s21 }
 0x115   :  { %15 = sbr.rel (!%p13_p5) target bundleno = 2 (0x2), region = 86 }

// kernel: mhsa_forward.3
= control target key start
LH: loop header
LB: loop body
LE: loop exit
PB: predicated region body
PF: predicated region fallthrough
CT: control target
= control target key end

     0   :  { %10 = vsyncpa [#allocation5], 0  ;;  %s1323_s0 = inlined_call_operand.vmem [shape: bf16[2,8,32], index: 0, kind: input, shape index: {}]   ;;  %s1324_s1 = inlined_call_operand.vmem [shape: bf16[2,8,32], index: 1, kind: input, shape index: {}]   ;;  %s1325_s2 = inlined_call_operand.vmem [shape: bf16[2,8,32], index: 2, kind: input, shape index: {}]   ;;  %s1326_s3 = inlined_call_operand.vmem [shape: bf16[32,32], index: 3, kind: input, shape index: {}]   ;;  %s1327_s4 = inlined_call_operand.vmem [shape: f32[1,32], index: 4, kind: input, shape index: {}]   ;;  %s1328_s5 = inlined_call_operand.hbm [shape: f32[2,8,32], index: 5, kind: output, shape index: {}]  }
   0x1   :  { %12 = vsyncpa [#allocation5 + $0x1], 0  ;;  %s1114_s18 = smov 0   ;;  %s1116_s19 = smov 0  }
   0x2   :  { %s1118_s20 = smov 0   ;;  %s1120_s21 = smov 0  }
   0x3   :  { %s1122_s22 = smov 0   ;;  %s1124_s23 = smov 0  }
   0x4 LB: > { %s862_s24 = sadd.s32 4294967295, %s1070_s23   ;;  %s863_s25 = sadd.s32 4294967294, %s1070_s23   ;;  %s1070_s23 = sphi %s1124_s23, %s18_s23   ;;  %s1066_s22 = sphi %s1122_s22, %s1335_s22   ;;  %s1062_s21 = sphi %s1120_s21, %s1334_s21   ;;  %s1058_s20 = sphi %s1118_s20, %s1333_s20   ;;  %s1054_s19 = sphi %s1116_s19, %s1332_s19   ;;  %s1050_s18 = sphi %s1114_s18, %s1331_s18  }
   0x5   : > { %s37_s26 = sadd.s32 1, %s1066_s22  ;;  %s172_s27 = sadd.s32 1, %s1058_s20 }
   0x6   : > { %p39_p0 = scmp.ge.s32.totalorder %s37_s26, 2  ;;  %p182_p1 = scmp.ne.s32.totalorder %s1058_s20, %s1054_s19 }
   0x7   : > { %p183_p2 = scmp.eq.s32.totalorder %s862_s24, 1  ;;  %p188_p3 = scmp.ne.s32.totalorder %s1054_s19, %s1050_s18 }
   0x8   : > { %s1337_s26 = smov (%p39_p0, %s37_s26), 0  ;;  %p189_p5 = scmp.eq.s32.totalorder %s863_s25, 1 }
   0x9   : > { %p1154_p4 = por %p183_p2, %p182_p1  ;;  %s167_s29 = ssub.s32 %s1066_s22, %s1337_s26 }
   0xa   : > { %p866_p6 = scmp.ge.s32.totalorder %s1070_s23, 1  ;;  %p170_p7 = scmp.eq.s32.totalorder %s167_s29, 0 }
   0xb   : > { %p1161_p8 = por %p189_p5, %p188_p3  ;;  %p243_p9 = scmp.lt.s32.totalorder %s1070_s23, 3 }
   0xc   : > { %s1167_s6 = scalar_select %p170_p7, %s1058_s20, %s172_s27  }
   0xd   : > { %p244_p10 = pnand %p866_p6, %p243_p9 }
   0xe   : > { %p287_p11 = scmp.lt.s32.totalorder (!%p244_p10), %s1062_s21, 1  ;;  %s1073_s15 = smov (!%p244_p10), 112  }
   0xf   : > { %247 = sbr.rel (%p244_p10) target bundleno = 1238 (0x4d6), region = 40  ;;  %s1074_s16 = smov (!%p244_p10), 120  }
  0x10   : > { %s1075_s17 = smov (!%p244_p10), 104   ;;  %s1081_s29 = smov (!%p244_p10), 8  }
  0x11   : > { %s284_s13 = sand.u32 (!%p244_p10), 1, %s1054_s19  }
  0x14   : > { %s288_s7 = scalar_select %p287_p11, %s1062_s21, 1  ;;  %vm321_vm0 = vcmask 64512   ;;  %v1072_v3 = vmov -inf   ;;  %v1076_v11 = vmov 0   ;;  %v1077_v12 = vmov 0.0  }
  0x15   : > { %315 = vst [vmem:[#allocation3] sm:$0xff] %v1072_v3  ;;  %961 = vset.pattern.permute.xlu1 %v1076_v11  ;;  %vm364_vm1 = vcmask 7168   ;;  %vm377_vm2 = vcmask 1043456   ;;  %v1078_v43 = vmov 1   ;;  %v1079_v44 = vmov 2  }
  0x16   : > { %s1171_s8 = sshll.u32 %s288_s7, 2  ;;  %317 = vst [vmem:[#allocation3 + $0x8] sm:$0xff] %v1077_v12  ;;  %962 = vset.pattern.permute.xlu2 %v1078_v43  ;;  %963 = vset.pattern.permute.xlu0 %v1079_v44  ;;  %v1080_v45 = vmov 3   ;;  %vm448_vm3 = vcmask 15368   ;;  %vm535_vm4 = vcmask 23568   ;;  %vm619_vm5 = vcmask 31768  }
  0x17   : > { %s300_s11 = scalar_lea.vmem %s1324_s1, %s1171_s8  ;;  %s293_s14 = scalar_lea.vmem %s1323_s0, %s1171_s8  ;;  %vm313_vm6 = vcmask 261120   ;;  %vm487_vm7 = vcmask 130112   ;;  %vm571_vm8 = vcmask 195712   ;;  %vm655_vm9 = vcmask 261312  }
  0x18   : > { %v319_v0 = vld [vmem:[%s300_s11] sm:$0xf]  ;;  %s307_s27 = scalar_lea.vmem %s1325_s2, %s1171_s8  ;;  %314 = vst.msk [vmem:[#allocation2] sm:$0xff] %vm313_vm6, %v1077_v12  ;;  %s1082_s7 = smov 16  }
  0x19   : > { %v326_v1 = vsel %vm321_vm0, %v319_v0, 0  ;;  %v318_v2 = vld [vmem:[%s293_s14] sm:$0xf]  ;;  %v403_v6 = vunpack.c.l.b16 %v319_v0  ;;  %s1083_s8 = smov 24   ;;  %s889_s14 = sshll.u32 %s1062_s21, 3 }
  0x1a   : > { %335 = vmatpush.bf16.xpose.msra.mxu0 %v326_v1  ;;  %v398_v9 = vunpack.c.l.b16 %v318_v2  ;;  %v320_v16 = vld [vmem:[%s307_s27] sm:$0xf]  ;;  %s753_s24 = scalar_lea.hbm %s1328_s5, %s889_s14  ;;  %s742_s21 = scalar_lea.sflag [#allocation5], %s284_s13 }
  0x1b   : > { %v404_v7 = vpack.c.b16 %v403_v6, %v403_v6  ;;  %v379_v17 = vsel %vm377_vm2, %v320_v16, 0  ;;  %v459_v40 = vunpack.c.l.b16 %v320_v16  ;;  %s1012_s14 = scalar_lea.hbm %s1328_s5, 16 }
  0x1c   : > { %v399_v10 = vpack.c.b16 %v398_v9, %v398_v9  ;;  %388 = vmatpush.bf16.msra.mxu1 %v379_v17 }
  0x1d   : > { %492 = vrot.lane.b32.xlu2 %v404_v7, %s1073_s15  ;;  %v460_v41 = vpack.c.b16 %v459_v40, %v459_v40 }
  0x21   : > { %871 = vmatmul.msk.bf16.vlgmr.msra.gmra.mxu0 %vm321_vm0, %v318_v2 }
  0x25   : > { %490 = vrot.lane.b32.xlu2 %v399_v10, %s1073_s15 }
  0x2d   : > { %574 = vrot.lane.b32.xlu2 %v399_v10, %s1075_s17 }
  0x77   : > { %v493_v18 = vpop.permute.xlu2 %492 }
  0x78   : > { %v498_v19 = vsel %vm321_vm0, %v493_v18, 0 }
  0x79   : > { %507 = vmatpush.bf16.xpose.msrb.mxu1 %v498_v19 }
  0x7f   : > { %v491_v26 = vpop.permute.xlu2 %490 }
  0x87   : > { %v575_v29 = vpop.permute.xlu2 %574 }
  0x9e   : > { %v337_v4 = vpop.f32.mrf.mxu0 }
  0x9f   : > { %v344_v5 = vsel %vm321_vm0, %v337_v4, -inf }
  0xa0   : > { %345 = vmax.xlane.f32.xlu0 %v344_v5 }
  0xa6   : > { %v339_v8 = vpop.f32.mrf.mxu0 }
  0xb4   : > { %405 = vrot.lane.b32.xlu0 %v404_v7, %s1074_s16 }
 0x113   : > { %v1190_v13 = vpop.xlane.xlu0 %345 }
 0x114   : > { %396 = vst.msk [vmem:[#allocation3] sm:$0xff] %vm364_vm1, %v1190_v13  ;;  %353 = vperm.xlu1 %961, %v1190_v13   ;;  %v348_v5 = vsub.f32 -inf, %v1190_v13 }
 0x116   : > { %v349_v8 = vmul.f32 1.442695, %v348_v5 }
 0x11b   : > { %v1223_v46 = vld [vmem:[#allocation3] sm:$0xff] }
 0x11c   : > { %400 = vrot.lane.b32.xlu1 %v399_v10, %s1074_s16 }
 0x11d   : > { %964 = vset.pattern.permute.xlu1 %v1080_v45 }
 0x124   : > { %576 = vrot.lane.b32.xlu1 %v404_v7, %s1075_s17 }
 0x126   : > { %v406_v14 = vpop.permute.xlu0 %405 }
 0x127   : > { %v411_v15 = vsel %vm321_vm0, %v406_v14, 0 }
 0x128   : > { %420 = vmatpush.bf16.xpose.msra.mxu2 %v411_v15 }
 0x186   : > { %v354_v20 = vpop.permute.xlu1 %353 }
 0x187   : > { %v356_v21 = vsub.f32 %v337_v4, %v354_v20 }
 0x189   : > { %v357_v22 = vmul.f32 1.442695, %v356_v21 }
 0x18b   : > { %974 = vpow2.f32 %v357_v22 }
 0x18e   : > { %v401_v23 = vpop.permute.xlu1 %400 }
 0x18f   : > { %873 = vmatmul.msk.bf16.vlgmr.msra.gmra.mxu2 %vm321_vm0, %v401_v23 }
 0x191   : > { %v975_v24 = vpop.eup %974 }
 0x192   : > { %v373_v25 = vpack.c.bf16 %v975_v24, %v975_v24  ;;  %v360_v60 = vsel %vm321_vm0, %v975_v24, 0.0 }
 0x194   : > { %872 = vmatmul.msk.bf16.vlgmr.msra.gmra.mxu1 %vm321_vm0, %v373_v25 }
 0x196   : > { %v577_v27 = vpop.permute.xlu1 %576 }
 0x197   : > { %v582_v28 = vsel %vm321_vm0, %v577_v27, 0 }
 0x198   : > { %591 = vmatpush.bf16.xpose.msrb.mxu0 %v582_v28 }
 0x19f   : > { %877 = vmatmul.msk.bf16.vlgmr.msrb.gmra.mxu0 %vm321_vm0, %v575_v29 }
 0x1a4   : > { %875 = vmatmul.msk.bf16.vlgmr.msrb.gmra.mxu1 %vm321_vm0, %v491_v26 }
 0x211   : > { %v1209_v30 = vpop.f32.mrf.mxu1 }
 0x212   : > { %v422_v31 = vpop.f32.mrf.mxu2 }
 0x213   : > { %v428_v32 = vsel %vm321_vm0, %v422_v31, -inf }
 0x214   : > { %429 = vmax.xlane.f32.xlu1 %v428_v32 }
 0x219   : > { %v392_v33 = vpop.f32.mrf.mxu1 }
 0x21a   : > { %v424_v34 = vpop.f32.mrf.mxu2 }
 0x21c   : > { %v1212_v35 = vpop.f32.mrf.mxu0 }
 0x21d   : > { %v599_v36 = vsel %vm321_vm0, %v1212_v35, -inf }
 0x21e   : > { %600 = vmax.xlane.f32.xlu0 %v599_v36 }
 0x221   : > { %v1216_v37 = vpop.f32.mrf.mxu1 }
 0x222   : > { %v515_v38 = vsel %vm321_vm0, %v1216_v37, -inf }
 0x223   : > { %516 = vmax.xlane.f32.xlu2 %v515_v38 }
 0x224   : > { %v595_v39 = vpop.f32.mrf.mxu0 }
 0x229   : > { %v511_v42 = vpop.f32.mrf.mxu1 }
 0x22d   : > { %461 = vrot.lane.b32.xlu1 %v460_v41, %s1074_s16 }
 0x287   : > { %v430_v47 = vpop.xlane.xlu1 %429 }
 0x288   : > { %v1226_v48 = vmax.f32 %v1223_v46, %v430_v47 }
 0x28a   : > { %v432_v49 = vsub.f32 %v1223_v46, %v1226_v48  ;;  %489 = vst.msk [vmem:[#allocation3] sm:$0xff] %vm448_vm3, %v1226_v48  ;;  %437 = vperm.xlu2 %962, %v1226_v48  }
 0x28c   : > { %v433_v25 = vmul.f32 1.442695, %v432_v49 }
 0x291   : > { %v513_v51 = vld [vmem:[#allocation3] sm:$0xff]  ;;  %v601_v54 = vpop.xlane.xlu0 %600 }
 0x292   : > { %545 = vrot.lane.b32.xlu2 %v460_v41, %s1073_s15  ;;  %s867_s15 = sshll.u32 %s284_s13, 3 }
 0x293   : > { %965 = vset.pattern.permute.xlu2 %v1076_v11 }
 0x296   : > { %v517_v50 = vpop.xlane.xlu2 %516 }
 0x297   : > { %v518_v52 = vmax.f32 %v513_v51, %v517_v50 }
 0x299   : > { %v519_v53 = vsub.f32 %v513_v51, %v518_v52  ;;  %573 = vst.msk [vmem:[#allocation3] sm:$0xff] %vm535_vm4, %v518_v52  ;;  %524 = vperm.xlu0 %963, %v518_v52  }
 0x29a   : > { %629 = vrot.lane.b32.xlu2 %v460_v41, %s1075_s17 }
 0x29b   : > { %v520_v9 = vmul.f32 1.442695, %v519_v53 }
 0x29f   : > { %v462_v58 = vpop.permute.xlu1 %461 }
 0x2a0   : > { %v597_v55 = vld [vmem:[#allocation3] sm:$0xff]  ;;  %v467_v59 = vsel %vm377_vm2, %v462_v58, 0 }
 0x2a1   : > { %v602_v56 = vmax.f32 %v597_v55, %v601_v54  ;;  %969 = vset.pattern.permute.xlu0 %v1076_v11  ;;  %476 = vmatpush.bf16.msra.mxu3 %v467_v59 }
 0x2a3   : > { %v603_v57 = vsub.f32 %v597_v55, %v602_v56  ;;  %657 = vst.msk [vmem:[#allocation3] sm:$0xff] %vm619_vm5, %v602_v56  ;;  %608 = vperm.xlu1 %964, %v602_v56  }
 0x2a5   : > { %v604_v26 = vmul.f32 1.442695, %v603_v57 }
 0x2ab   : > { %966 = vset.pattern.permute.xlu1 %v1078_v43 }
 0x2cd   : > { %361 = vadd.xlane.f32.xlu1 %v360_v60 }
 0x2e4   : > { %v438_v61 = vpop.permute.xlu2 %437 }
 0x2e5   : > { %v440_v62 = vsub.f32 %v422_v31, %v438_v61 }
 0x2e7   : > { %v441_v63 = vmul.f32 1.442695, %v440_v62 }
 0x2e9   : > { %976 = vpow2.f32 %v441_v63 }
 0x2ea   : > { %978 = vpow2.f32 %v349_v8 }
 0x2eb   : > { %980 = vpow2.f32 %v520_v9  ;;  %v893_v9 = vld [vmem:[%s1326_s3 + $0x8] sm:$0xff] }
 0x2ec   : > { %v546_v0 = vpop.permute.xlu2 %545  ;;  %733 = vmatpush.bf16.msra.mxu1 %v893_v9 }
 0x2ed   : > { %v551_v1 = vsel %vm377_vm2, %v546_v0, 0 }
 0x2ee   : > { %560 = vmatpush.bf16.msrb.mxu3 %v551_v1 }
 0x2ef   : > { %v977_v2 = vpop.eup %976 }
 0x2f0   : > { %v444_v3 = vsel %vm321_vm0, %v977_v2, 0.0  ;;  %v457_v4 = vpack.c.bf16 %v977_v2, %v977_v2  ;;  %v979_v10 = vpop.eup %978 }
 0x2f1   : > { %445 = vadd.xlane.f32.xlu2 %v444_v3  ;;  %v981_v16 = vpop.eup %980  ;;  %v359_v28 = vmul.f32 0.0, %v979_v10 }
 0x2f2   : > { %874 = vmatmul.msk.bf16.vlgmr.msra.gmra.mxu3 %vm321_vm0, %v457_v4 }
 0x2f4   : > { %v630_v6 = vpop.permute.xlu2 %629 }
 0x2f5   : > { %v635_v7 = vsel %vm377_vm2, %v630_v6, 0 }
 0x2f6   : > { %644 = vmatpush.bf16.msrb.mxu2 %v635_v7 }
 0x309   : > { %369 = vperm.xlu2 %965, %v979_v10   ;;  %v892_v10 = vld [vmem:[%s1326_s3] sm:$0xff] }
 0x30a   : > { %734 = vmatpush.bf16.msra.mxu1 %v892_v10 }
 0x30b   : > { %v525_v11 = vpop.permute.xlu0 %524 }
 0x30c   : > { %v527_v14 = vsub.f32 %v1216_v37, %v525_v11  ;;  %v366_v37 = vld [vmem:[#allocation2] sm:$0xff] }
 0x30e   : > { %v528_v15 = vmul.f32 1.442695, %v527_v14 }
 0x310   : > { %982 = vpow2.f32 %v528_v15 }
 0x311   : > { %967 = vset.pattern.permute.xlu2 %v1079_v44 }
 0x312   : > { %540 = vperm.xlu2 %967, %v981_v16  }
 0x315   : > { %v609_v17 = vpop.permute.xlu1 %608 }
 0x316   : > { %v983_v13 = vpop.eup %982  ;;  %v611_v18 = vsub.f32 %v1212_v35, %v609_v17 }
 0x317   : > { %v531_v19 = vsel %vm321_vm0, %v983_v13, 0.0  ;;  %v544_v20 = vpack.c.bf16 %v983_v13, %v983_v13 }
 0x318   : > { %v612_v21 = vmul.f32 1.442695, %v611_v18  ;;  %532 = vadd.xlane.f32.xlu0 %v531_v19 }
 0x319   : > { %876 = vmatmul.msk.bf16.vlgmr.msrb.gmra.mxu3 %vm321_vm0, %v544_v20 }
 0x31a   : > { %984 = vpow2.f32 %v612_v21 }
 0x31b   : > { %986 = vpow2.f32 %v433_v25 }
 0x31c   : > { %988 = vpow2.f32 %v604_v26 }
 0x320   : > { %v985_v22 = vpop.eup %984 }
 0x321   : > { %v615_v23 = vsel %vm321_vm0, %v985_v22, 0.0  ;;  %v628_v24 = vpack.c.bf16 %v985_v22, %v985_v22  ;;  %v987_v27 = vpop.eup %986 }
 0x322   : > { %616 = vadd.xlane.f32.xlu1 %v615_v23  ;;  %v989_v32 = vpop.eup %988  ;;  %v973_v23 = vld [vmem:[%s1327_s4] ss:$0 sm:$0xff] }
 0x323   : > { %878 = vmatmul.msk.bf16.vlgmr.msrb.gmra.mxu2 %vm321_vm0, %v628_v24 }
 0x33b   : > { %453 = vperm.xlu1 %966, %v987_v27  }
 0x340   : > { %v362_v29 = vpop.xlane.xlu1 %361 }
 0x341   : > { %v363_v31 = vadd.f32 %v362_v29, %v359_v28 }
 0x343   : > { %365 = vst.msk [vmem:[#allocation3 + $0x8] sm:$0xff] %vm364_vm1, %v363_v31  ;;  %968 = vset.pattern.permute.xlu1 %v1080_v45 }
 0x344   : > { %624 = vperm.xlu1 %968, %v989_v32  }
 0x34a   : > { %v427_v33 = vld [vmem:[#allocation3 + $0x8] sm:$0xff] }
 0x34b   : > { %v443_v34 = vmul.f32 %v987_v27, %v427_v33 }
 0x34c   : > { %970 = vset.pattern.permute.xlu1 %v1078_v43 }
 0x364   : > { %v446_v35 = vpop.xlane.xlu2 %445 }
 0x365   : > { %v447_v36 = vadd.f32 %v446_v35, %v443_v34 }
 0x367   : > { %449 = vst.msk [vmem:[#allocation3 + $0x8] sm:$0xff] %vm448_vm3, %v447_v36 }
 0x36c   : > { %v370_v38 = vpop.permute.xlu2 %369 }
 0x36d   : > { %v372_v39 = vmul.f32 %v370_v38, %v366_v37 }
 0x36e   : > { %v514_v12 = vld [vmem:[#allocation3 + $0x8] sm:$0xff] }
 0x36f   : > { %v394_v40 = vadd.f32 %v1209_v30, %v372_v39  ;;  %v530_v44 = vmul.f32 %v981_v16, %v514_v12 }
 0x371   : > { %395 = vst.msk [vmem:[#allocation2] sm:$0xff] %vm321_vm0, %v394_v40 }
 0x374   : > { %v541_v62 = vpop.permute.xlu2 %540 }
 0x375   : > { %v478_v41 = vpop.f32.mrf.mxu3 }
 0x376   : > { %483 = vrot.lane.b32.xlu0 %v478_v41, %s1081_s29  ;;  %s286_s29 = scalar_lea.vmem [#allocation4], %s867_s15 }
 0x378   : > { %v450_v57 = vld [vmem:[#allocation2] sm:$0xff] }
 0x37d   : > { %v480_v42 = vpop.f32.mrf.mxu3 }
 0x38b   : > { %v533_v43 = vpop.xlane.xlu0 %532 }
 0x38c   : > { %v534_v46 = vadd.f32 %v533_v43, %v530_v44 }
 0x38e   : > { %536 = vst.msk [vmem:[#allocation3 + $0x8] sm:$0xff] %vm535_vm4, %v534_v46 }
 0x395   : > { %v598_v47 = vld [vmem:[#allocation3 + $0x8] sm:$0xff]  ;;  %v617_v49 = vpop.xlane.xlu1 %616 }
 0x396   : > { %v614_v48 = vmul.f32 %v989_v32, %v598_v47 }
 0x398   : > { %v618_v50 = vadd.f32 %v617_v49, %v614_v48 }
 0x39a   : > { %620 = vst.msk [vmem:[#allocation3 + $0x8] sm:$0xff] %vm619_vm5, %v618_v50 }
 0x39c   : > { %v562_v51 = vpop.f32.mrf.mxu3 }
 0x39d   : > { %567 = vrot.lane.b32.xlu0 %v562_v51, %s1082_s7  ;;  %s755_s7 = sshll.u32 %s286_s29, 4  ;;  %s756_s7 = int_to_ptr.vmem [resolvable:$true] %s755_s7 }
 0x3a1   : > { %v672_v30 = vld [vmem:[#allocation3 + $0x8] sm:$0xff] }
 0x3a2   : > { %990 = vrcp.f32 %v672_v30 }
 0x3a4   : > { %v564_v52 = vpop.f32.mrf.mxu3 }
 0x3a6   : > { %v646_v53 = vpop.f32.mrf.mxu2 }
 0x3a7   : > { %651 = vrot.lane.b32.xlu2 %v646_v53, %s1083_s8  ;;  %s757_s8 = sshll.u32 %s753_s24, 4  ;;  %s758_s8 = int_to_ptr.hbm [resolvable:$true] %s757_s8 }
 0x3a8   : > { %v991_v54 = vpop.eup %990  ;;  %s1006_s9 = sshra.s32 %s758_s8, 4  ;;  %s1007_s9 = int_to_ptr.hbm [resolvable:$true] %s1006_s9 }
 0x3a9   : > { %676 = vperm.xlu1 %970, %v991_v54   ;;  %666 = vperm.xlu0 %969, %v991_v54   ;;  %s1008_s10 = scalar_lea.hbm %s1007_s9, 8  ;;  %p1013_p1 = scmp.lt.s32.totalorder %s1007_s9, %s1328_s5 }
 0x3aa   : > { %p1009_p12 = scmp.ne.s32.totalorder %s1007_s9, %s1008_s10  ;;  %p1014_p2 = scmp.lt.s32.totalorder %s1012_s14, %s1008_s10 }
 0x3ac   : > { %p1010_p13 = pnand %p1009_p12, %p1154_p4  ;;  %p1015_p3 = por %p1014_p2, %p1013_p1 }
 0x3ad   : > { %v454_v56 = vpop.permute.xlu1 %453 }
 0x3ae   : > { %v648_v55 = vpop.f32.mrf.mxu2  ;;  %v456_v58 = vmul.f32 %v454_v56, %v450_v57  ;;  %p1011_p0 = pneg %p1010_p13 }
 0x3af   : > { %686 = vperm.xlu2 %967, %v991_v54  }
 0x3b0   : > { %p1016_p5 = pnand %p1015_p3, %p1011_p0 }
 0x3b1   : > { %971 = vset.pattern.permute.xlu1 %v1080_v45  ;;  %972 = vset.pattern.permute.xlu0 %v1080_v45 }
 0x3b2   : > { %696 = vperm.xlu1 %971, %v991_v54  }
 0x3b6   : > { %v625_v2 = vpop.permute.xlu1 %624 }
 0x3e8   : > { %v484_v59 = vpop.permute.xlu0 %483 }
 0x3e9   : > { %v486_v60 = vadd.f32 %v484_v59, %v456_v58 }
 0x3eb   : > { %488 = vst.msk [vmem:[#allocation2] sm:$0xff] %vm487_vm7, %v486_v60 }
 0x3f2   : > { %v537_v61 = vld [vmem:[#allocation2] sm:$0xff] }
 0x3f3   : > { %v543_v63 = vmul.f32 %v541_v62, %v537_v61 }
 0x401   : > { %v652_v4 = vpop.permute.xlu2 %651 }
 0x409   : > { %v687_v16 = vpop.permute.xlu2 %686 }
 0x40f   : > { %v568_v0 = vpop.permute.xlu0 %567 }
 0x410   : > { %v570_v1 = vadd.f32 %v568_v0, %v543_v63 }
 0x412   : > { %572 = vst.msk [vmem:[#allocation2] sm:$0xff] %vm571_vm8, %v570_v1 }
 0x419   : > { %v621_v3 = vld [vmem:[#allocation2] sm:$0xff] }
 0x41a   : > { %v627_v45 = vmul.f32 %v625_v2, %v621_v3 }
 0x41b   : > { %v667_v7 = vpop.permute.xlu0 %666  ;;  %v677_v11 = vpop.permute.xlu1 %676 }
 0x41c   : > { %v654_v5 = vadd.f32 %v652_v4, %v627_v45 }
 0x41e   : > { %656 = vst.msk [vmem:[#allocation2] sm:$0xff] %vm655_vm9, %v654_v5 }
 0x424   : > { %v697_v18 = vpop.permute.xlu1 %696 }
 0x425   : > { %v661_v6 = vld [vmem:[#allocation2] sm:$0xff] }
 0x426   : > { %v669_v8 = vmul.f32 %v667_v7, %v661_v6 }
 0x428   : > { %670 = vst.msk [vmem:[#allocation2] sm:$0xff] %vm321_vm0, %v669_v8 }
 0x42f   : > { %v671_v14 = vld [vmem:[#allocation2] sm:$0xff] }
 0x430   : > { %v679_v15 = vmul.f32 %v677_v11, %v671_v14 }
 0x432   : > { %680 = vst.msk [vmem:[#allocation2] sm:$0xff] %vm487_vm7, %v679_v15 }
 0x439   : > { %v681_v17 = vld [vmem:[#allocation2] sm:$0xff] }
 0x43a   : > { %v689_v13 = vmul.f32 %v687_v16, %v681_v17 }
 0x43c   : > { %690 = vst.msk [vmem:[#allocation2] sm:$0xff] %vm571_vm8, %v689_v13 }
 0x443   : > { %v691_v19 = vld [vmem:[#allocation2] sm:$0xff] }
 0x444   : > { %v699_v20 = vmul.f32 %v697_v18, %v691_v19 }
 0x446   : > { %700 = vst.msk [vmem:[#allocation2] sm:$0xff] %vm655_vm9, %v699_v20 }
 0x44d   : > { %v701_v21 = vld [vmem:[#allocation2] sm:$0xff] }
 0x44e   : > { %v702_v22 = vpack.c.bf16 %v701_v21, %v701_v21 }
 0x450   : > { %887 = vmatmul.msk.bf16.vlgmr.msra.gmra.mxu1 %vm313_vm6, %v702_v22 }
 0x4cd   : > { %v736_v24 = vpop.f32.mrf.mxu1 }
 0x4ce   : > { %v737_v25 = vadd.f32 %v973_v23, %v736_v24 }
 0x4d0   : > { %740 = vst.msk [vmem:[%s286_s29] sm:$0xff] %vm313_vm6, %v737_v25 }
 0x4d1   : > { %1019 = shalt.err (!%p1016_p5)
}
 0x4d2   : > { %894 = dma.vmem_to_hbm [thread:$0]  (%p1154_p4), %s756_s7, 128, %s758_s8, %s742_s21  }
 0x4d5   : > { %v738_v26 = vpop.f32.mrf.mxu1 }
 0x4d6 PF: > { %p900_p6 = scmp.ge.s32.totalorder %s1070_s23, 2  ;;  %s769_s13 = sand.u32 1, %s1050_s18  }
 0x4d7   : > { %s770_s17 = scalar_lea.sflag [#allocation5], %s769_s13 }
 0x4d8   : > { %p897_p7 = pnand %p900_p6, %p1161_p8 }
 0x4da   : > { %p898_p9 = pneg %p897_p7 }
 0x4dc   : > { %1045 = dma.done.wait (%p898_p9), %s770_s17, 128  }
 0x4dd   : > { %1047 = vsyncadd (%p898_p9), %s770_s17, 4294967168  ;;  %s18_s23 = sadd.s32 1, %s1070_s23   ;;  %s1331_s18 = smov %s1054_s19 }
 0x4de   : > { %p15_p10 = scmp.ge.s32.totalorder %s18_s23, 4   ;;  %s1332_s19 = smov %s1058_s20 }
 0x4df   : > { %s1333_s20 = smov %s1167_s6  ;;  %s1334_s21 = smov %s1066_s22 }
 0x4e0   : > { %s1335_s22 = smov %s1337_s26  ;;  %17 = sbr.rel (!%p15_p10) target bundleno = 4 (0x4), region = 91 }
 0x4e5   :  { %776 = vsyncpa [#allocation5], 1 }
 0x4e6   :  { %778 = vsyncpa [#allocation5 + $0x1], 1 }

</bundles_post_ra>
